<compile_context>
chip_gen: v5e
topology: v5e:2x2
jax: 0.10.0
libtpu: 0.0.40
codegen_flags: <defaults>
</compile_context>

<pallas_src>
import math
import numpy as np
import jax
import jax.numpy as jnp
from jax.experimental import pallas as pl
from jax.experimental.pallas import tpu as pltpu

SEQ = 21          # fixed by TextNN (cat([v_f]*21, dim=1), temp = [0]*21)
D_WORD = 300
D_MODEL = 256
C_IN = 3 * 32     # Conv2d(3*32, 256, 1)
N_VOCAB = 150     # fc_comp2 out features
N_PAD = 256       # fc_comp2 padded to a full lane multiple; wrapper slices back


# ----------------------------------------------------------------------------
# Pallas kernel: after exact offline folding the whole forward is one matmul + adds.
# ----------------------------------------------------------------------------
def textnn_kernel(pooled_ref,    # VMEM (TB, C_IN)   f32  spatially-pooled visual input
                  wordlog_ref,   # VMEM (TB, N_PAD)  f32  word_logit_table[position[b]]
                  w_ref,         # VMEM (C_IN, N_PAD) bf16 fully folded weight W_all
                  b_ref,         # VMEM (1, N_PAD)   f32  fully folded bias b_all
                  out_ref):      # VMEM (TB, N_PAD)  f32  logits (padded)
    # Single MXU op on the critical path; f32 accumulation, bf16 only at the dot site.
    acc = jnp.dot(pooled_ref[...].astype(jnp.bfloat16), w_ref[...],
                  preferred_element_type=jnp.float32)            # (TB, N_PAD)
    out_ref[...] = acc + wordlog_ref[...] + b_ref[...]           # f32 elementwise (VPU)


# ----------------------------------------------------------------------------
# Parameters (PyTorch layout), offline exact folding, wrapper, pure-JAX reference.
# ----------------------------------------------------------------------------
def sinusoidal_embedding(num_embeddings, embedding_dim, padding_idx=0):
    half_dim = embedding_dim // 2
    emb = math.log(10000.0) / (half_dim - 1)
    emb = np.exp(np.arange(half_dim, dtype=np.float32) * -emb)
    emb = np.arange(num_embeddings, dtype=np.float32)[:, None] * emb[None, :]
    emb = np.concatenate([np.sin(emb), np.cos(emb)], axis=1).reshape(num_embeddings, -1)
    if embedding_dim % 2 == 1:
        emb = np.concatenate([emb, np.zeros((num_embeddings, 1), np.float32)], axis=1)
    if padding_idx is not None:
        emb[padding_idx, :] = 0.0
    return jnp.asarray(emb, jnp.float32)


def init_params(key):
    """PyTorch-layout parameters (dense weights stored [in_features, out_features])."""
    ks = jax.random.split(key, 12)

    def dense(k, fin, fout):
        bound = 1.0 / math.sqrt(fin)
        kw, kb = jax.random.split(k)
        w = jax.random.uniform(kw, (fin, fout), jnp.float32, -bound, bound)
        b = jax.random.uniform(kb, (1, fout), jnp.float32, -bound, bound)
        return w, b

    p = {}
    p['conv_w'], p['conv_b'] = dense(ks[0], C_IN, D_MODEL)     # Conv2d(96, 256, 1) as (Cin, Cout)
    p['vfc_w'], p['vfc_b'] = dense(ks[1], D_MODEL, D_MODEL)    # v_fc
    p['wfc_w'], p['wfc_b'] = dense(ks[2], D_WORD, D_MODEL)     # word_fc
    p['fc1_w'], p['fc1_b'] = dense(ks[3], D_MODEL, D_MODEL)    # fc_comp1
    p['fc2_w'], p['fc2_b'] = dense(ks[4], D_MODEL, N_VOCAB)    # fc_comp2
    p['wq'] = dense(ks[5], D_MODEL, D_MODEL)[0]                # cross-attention stand-in
    p['wk'] = dense(ks[6], D_MODEL, D_MODEL)[0]
    p['wv'] = dense(ks[7], D_MODEL, D_MODEL)[0]
    p['wo'] = dense(ks[8], D_MODEL, D_MODEL)[0]
    # mask_vec / start_vec are zero-initialized nn.Parameters in the module; use small
    # deterministic values so the masking path does real work in the reference check.
    p['mask_vec'] = 0.02 * jax.random.normal(ks[9], (1, D_WORD), jnp.float32)
    p['start_vec'] = 0.02 * jax.random.normal(ks[10], (1, D_WORD), jnp.float32)
    p['pos_emb'] = sinusoidal_embedding(SEQ, D_WORD, padding_idx=0)   # (21, 300)
    return p


def fuse_params(p):
    """Exact offline folding of the (all-linear) TextNN forward.  Done once in f32.

    * GAP commutes with the 1x1 conv: mean(Wx+b) == W*mean(x)+b, so conv folds into a
      (C_IN, 256) matmul applied to the spatially-pooled input.
    * The cross-attention stand-in has 21 identical keys => exactly uniform softmax =>
      its contribution is vfeat @ (wv @ wo); wq / wk drop out.
    * fc_comp1 -> fc_comp2 has no nonlinearity between them in the module, so they fold.
    * The word branch is only ever read at the masked row, which is mask_vec + pos_emb[p],
      so the whole branch precomputes to a (21, N_PAD) logit-space table.
    * fc_comp2 is zero-padded 150 -> 256 output lanes (full-lane stores); the pad columns
      of every folded tensor are exactly zero, so slicing back is exact.
    Only the single remaining matmul weight is cast to bf16; everything else stays f32.
    """
    fc2_w = jnp.zeros((D_MODEL, N_PAD), jnp.float32).at[:, :N_VOCAB].set(p['fc2_w'])
    fc2_b = jnp.zeros((1, N_PAD), jnp.float32).at[:, :N_VOCAB].set(p['fc2_b'])

    w_vis = p['conv_w'] @ p['vfc_w']                          # (96, 256)
    b_vis = p['conv_b'] @ p['vfc_w'] + p['vfc_b']             # (1, 256)
    w_vo = p['wv'] @ p['wo']                                  # (256, 256)
    w12 = p['fc1_w'] @ fc2_w                                  # (256, N_PAD)
    b12 = p['fc1_b'] @ fc2_w + fc2_b                          # (1, N_PAD)

    w_all = w_vis @ w_vo @ w12                                # (96, N_PAD)
    b_all = b_vis @ w_vo @ w12 + b12                          # (1, N_PAD)
    word_logit_table = ((p['mask_vec'] + p['pos_emb']) @ p['wfc_w'] + p['wfc_b']) @ w12
    return {
        'w_all': w_all.astype(jnp.bfloat16),                  # bf16 only at the dot site
        'b_all': b_all,                                       # f32
        'word_logit_table': word_logit_table,                 # (21, N_PAD) f32
    }


def textnn_forward(fused, visual_feat_nchw, words_feat, position):
    """Fused forward.  `words_feat` is accepted for API parity with the PyTorch module, but
    with the degenerate single-layer attention stand-in the output provably does not depend
    on it (only mask_vec + pos_emb[position] survives); the reference check verifies this."""
    B = visual_feat_nchw.shape[0]
    assert visual_feat_nchw.shape[1] == C_IN
    del words_feat  # unused under the stand-in configuration (see module TODO at top)

    # GAP hoisted to the wrapper (review #3): shrinks the visual DMA by H*W and removes the
    # NCHW->NHWC relayout; exact because the mean commutes with the (folded) 1x1 conv.
    pooled = jnp.mean(visual_feat_nchw, axis=(2, 3))                       # (B, C_IN) f32

    # Clamp positions (VMEM/table reads have no runtime bounds check), then gather the
    # precomputed word-branch logit rows in XLA (review #2/#5); fuses into the jit prologue.
    pos = jnp.clip(position.astype(jnp.int32), 0, SEQ - 1)
    word_rows = fused['word_logit_table'][pos]                             # (B, N_PAD) f32

    # Pad batch to a sublane multiple so the output stores are full (8,128) tiles (review #8);
    # for large batches split the batch across TensorCores via a "parallel" grid (review #6).
    Bp = ((B + 7) // 8) * 8
    if Bp > 256:
        TB = 256
        Bp = ((Bp + TB - 1) // TB) * TB
    else:
        TB = Bp
    if Bp != B:
        pooled = jnp.pad(pooled, ((0, Bp - B), (0, 0)))
        word_rows = jnp.pad(word_rows, ((0, Bp - B), (0, 0)))

    logits_pad = pl.pallas_call(
        textnn_kernel,
        out_shape=jax.ShapeDtypeStruct((Bp, N_PAD), jnp.float32),
        grid=(Bp // TB,),
        in_specs=[
            pl.BlockSpec((TB, C_IN), lambda i: (i, 0)),     # pooled visual input
            pl.BlockSpec((TB, N_PAD), lambda i: (i, 0)),    # gathered word-branch logits
            pl.BlockSpec((C_IN, N_PAD), lambda i: (0, 0)),  # folded weight (resident)
            pl.BlockSpec((1, N_PAD), lambda i: (0, 0)),     # folded bias (resident)
        ],
        out_specs=pl.BlockSpec((TB, N_PAD), lambda i: (i, 0)),
        compiler_params=pltpu.CompilerParams(
            dimension_semantics=("parallel",)),             # megacore split when Bp/TB > 1
    )(pooled, word_rows, fused['w_all'], fused['b_all'])
    return logits_pad[:B, :N_VOCAB]


def reference_forward(params, visual_feat_nchw, words_feat, position):
    """Pure-JAX mirror of the un-collapsed f32 math: conv -> GAP -> v_fc, full-sequence
    word masking + positional embedding + word_fc, the single cross-attention stand-in
    with softmax, per-batch index_select, fc_comp1/2."""
    B, C, H, W = visual_feat_nchw.shape
    vis = jnp.transpose(visual_feat_nchw, (0, 2, 3, 1)).reshape(B, H * W, C)
    conv = vis @ params['conv_w'] + params['conv_b']
    pooled = jnp.mean(conv, axis=1)
    vfeat = pooled @ params['vfc_w'] + params['vfc_b']
    visual_seq = jnp.broadcast_to(vfeat[:, None, :], (B, SEQ, D_MODEL))

    words = words_feat.at[:, 0, :].set(params['start_vec'][0])
    oh = jax.nn.one_hot(position, SEQ, dtype=jnp.float32)[:, :, None]
    words = words * (1.0 - oh) + params['mask_vec'][None] * oh
    words = words + params['pos_emb'][None]
    wfeat = words @ params['wfc_w'] + params['wfc_b']

    q = wfeat @ params['wq']
    k = visual_seq @ params['wk']
    v = visual_seq @ params['wv']
    scores = jnp.einsum('bqd,bkd->bqk', q, k) / math.sqrt(D_MODEL)
    p = jax.nn.softmax(scores, axis=-1)
    out = wfeat + (jnp.einsum('bqk,bkd->bqd', p, v) @ params['wo'])

    sel = jnp.take_along_axis(out, position[:, None, None], axis=1)[:, 0, :]
    h = sel @ params['fc1_w'] + params['fc1_b']
    return h @ params['fc2_w'] + params['fc2_b']


if __name__ == "__main__":
    key = jax.random.PRNGKey(0)
    kp, kv, kw, kpos = jax.random.split(key, 4)
    params = init_params(kp)
    fused = fuse_params(params)

    B, H, W = 2, 4, 4
    visual_feat = jax.random.normal(kv, (B, C_IN, H, W), jnp.float32)   # NCHW like PyTorch
    words_feat = jax.random.normal(kw, (B, SEQ, D_WORD), jnp.float32)
    position = jax.random.randint(kpos, (B,), 0, SEQ, dtype=jnp.int32)

    fwd = jax.jit(textnn_forward)
    logits = fwd(fused, visual_feat, words_feat, position)
    logits = jax.block_until_ready(logits)
    assert logits.shape == (B, N_VOCAB)

    ref = reference_forward(params, visual_feat, words_feat, position)
    # Tolerance sized for the single bf16 matmul (f32 accumulation); any semantic error in the
    # offline folds (conv/GAP, attention collapse, word table, fc1·fc2) would be O(0.1 - 1).
    np.testing.assert_allclose(np.asarray(logits), np.asarray(ref), rtol=1e-2, atol=1e-2)

    print("KERNEL_OK")
</pallas_src>

<mosaic_0001>
module attributes {stable_mosaic.version = 11 : i64} {
  func.func @textnn_kernel(%arg0: i32, %arg1: memref<8x96xf32, #tpu.memory_space<vmem>>, %arg2: memref<8x256xf32, #tpu.memory_space<vmem>>, %arg3: memref<96x256xbf16, #tpu.memory_space<vmem>>, %arg4: memref<1x256xf32, #tpu.memory_space<vmem>>, %arg5: memref<8x256xf32, #tpu.memory_space<vmem>>) attributes {dimension_semantics = [#tpu.dimension_semantics<parallel>], iteration_bounds = array<i64: 1>, scalar_prefetch = 0 : i64, scratch_operands = 0 : i64, tpu.core_type = #tpu.core_type<tc>, window_params = [{transform_indices = @transform_0, window_bounds = array<i64: 8, 96>}, {transform_indices = @transform_1, window_bounds = array<i64: 8, 256>}, {pipeline_mode = #tpu.pipeline_mode<synchronous>, transform_indices = @transform_2, window_bounds = array<i64: 96, 256>}, {pipeline_mode = #tpu.pipeline_mode<synchronous>, transform_indices = @transform_3, window_bounds = array<i64: 1, 256>}, {transform_indices = @transform_4, window_bounds = array<i64: 8, 256>}]} {
    %c0 = arith.constant 0 : index
    %c0_0 = arith.constant 0 : index
    %0 = vector.load %arg1[%c0, %c0_0] : memref<8x96xf32, #tpu.memory_space<vmem>>, vector<8x96xf32>
    %1 = arith.truncf %0 : vector<8x96xf32> to vector<8x96xbf16>
    %c0_1 = arith.constant 0 : index
    %c0_2 = arith.constant 0 : index
    %2 = vector.load %arg3[%c0_1, %c0_2] : memref<96x256xbf16, #tpu.memory_space<vmem>>, vector<96x256xbf16>
    %cst = arith.constant dense<0.000000e+00> : vector<8x256xf32>
    %3 = tpu.matmul %1, %2, %cst {dimension_numbers = #tpu.dot_dimension_numbers<[1], [0], [0], [1], [0, 0, 1, 1], [], []>} : vector<8x96xbf16>, vector<96x256xbf16>, vector<8x256xf32> -> vector<8x256xf32>
    %c0_3 = arith.constant 0 : index
    %c0_4 = arith.constant 0 : index
    %4 = vector.load %arg2[%c0_3, %c0_4] : memref<8x256xf32, #tpu.memory_space<vmem>>, vector<8x256xf32>
    %5 = arith.addf %3, %4 : vector<8x256xf32>
    %c0_5 = arith.constant 0 : index
    %c0_6 = arith.constant 0 : index
    %6 = vector.load %arg4[%c0_5, %c0_6] : memref<1x256xf32, #tpu.memory_space<vmem>>, vector<1x256xf32>
    %7 = vector.broadcast %6 : vector<1x256xf32> to vector<8x256xf32>
    %8 = arith.addf %5, %7 : vector<8x256xf32>
    %c0_7 = arith.constant 0 : index
    %c0_8 = arith.constant 0 : index
    %9 = vector.load %arg5[%c0_7, %c0_8] : memref<8x256xf32, #tpu.memory_space<vmem>>, vector<8x256xf32>
    tpu.vector_store %arg5[%c0_7, %c0_8], %8 {strides = array<i32>} : memref<8x256xf32, #tpu.memory_space<vmem>>, vector<8x256xf32>,
    return
  }
  func.func @transform_0(%arg0: i32) -> (i32, i32) {
    %c0_i32 = arith.constant 0 : i32
    %c0_i32_0 = arith.constant 0 : i32
    return %arg0, %c0_i32 : i32, i32
  }
  func.func @transform_1(%arg0: i32) -> (i32, i32) {
    %c0_i32 = arith.constant 0 : i32
    %c0_i32_0 = arith.constant 0 : i32
    return %arg0, %c0_i32 : i32, i32
  }
  func.func @transform_2(%arg0: i32) -> (i32, i32) {
    %c0_i32 = arith.constant 0 : i32
    %c0_i32_0 = arith.constant 0 : i32
    %c0_i32_1 = arith.constant 0 : i32
    return %c0_i32, %c0_i32_0 : i32, i32
  }
  func.func @transform_3(%arg0: i32) -> (i32, i32) {
    %c0_i32 = arith.constant 0 : i32
    %c0_i32_0 = arith.constant 0 : i32
    %c0_i32_1 = arith.constant 0 : i32
    return %c0_i32, %c0_i32_0 : i32, i32
  }
  func.func @transform_4(%arg0: i32) -> (i32, i32) {
    %c0_i32 = arith.constant 0 : i32
    %c0_i32_0 = arith.constant 0 : i32
    return %arg0, %c0_i32 : i32, i32
  }
}

</mosaic_0001>

<bundles_post_ra>
// kernel: textnn_forward.1
= control target key start
LH: loop header
LB: loop body
LE: loop exit
PB: predicated region body
PF: predicated region fallthrough
CT: control target
= control target key end

     0   :  { %vm94_vm0 = vcmask 785408   ;;  %s315_s2 = inlined_call_operand.vmem [shape: bf16[96,256], index: 2, kind: input, shape index: {}]   ;;  %s316_s0 = inlined_call_operand.vmem [shape: f32[8,96], index: 0, kind: input, shape index: {}]   ;;  %s317_s3 = inlined_call_operand.vmem [shape: f32[1,256], index: 3, kind: input, shape index: {}]   ;;  %s318_s1 = inlined_call_operand.vmem [shape: f32[8,256], index: 1, kind: input, shape index: {}]   ;;  %s319_s4 = inlined_call_operand.vmem [shape: f32[8,256], index: 4, kind: output, shape index: {}]  }
   0x1   :  { %v180_v0 = vld [vmem:[%s315_s2 + $0x50] sm:$0xf]  ;;  %v199_v1 = vld [vmem:[%s315_s2 + $0x54] sm:$0xf0]  ;;  %v198_v2 = vld [vmem:[%s315_s2 + $0x54] sm:$0xf] }
   0x2   :  { %v181_v3 = vor.u32 %v199_v1, %v180_v0  ;;  %v182_v4 = vld [vmem:[%s315_s2 + $0x58] sm:$0xf0]  ;;  %v172_v5 = vld [vmem:[%s315_s2 + $0x40] sm:$0xf]  ;;  %v197_v6 = vld [vmem:[%s315_s2 + $0x44] sm:$0xf0] }
   0x3   :  { %v185_v7 = vor.u32 %v198_v2, %v182_v4  ;;  %v196_v8 = vld [vmem:[%s315_s2 + $0x44] sm:$0xf]  ;;  %v174_v9 = vld [vmem:[%s315_s2 + $0x48] sm:$0xf0]  ;;  %v173_v10 = vor.u32 %v197_v6, %v172_v5  ;;  %v164_v12 = vld [vmem:[%s315_s2 + $0x30] sm:$0xf] }
   0x4   :  { %100 = vmatpush.bf16.msra.mxu0 %v181_v3  ;;  %v177_v11 = vor.u32 %v196_v8, %v174_v9  ;;  %v195_v13 = vld [vmem:[%s315_s2 + $0x34] sm:$0xf0]  ;;  %v194_v14 = vld [vmem:[%s315_s2 + $0x34] sm:$0xf]  ;;  %v166_v15 = vld [vmem:[%s315_s2 + $0x38] sm:$0xf0] }
   0x5   :  { %113 = vmatpush.bf16.msra.mxu1 %v185_v7  ;;  %v165_v16 = vor.u32 %v195_v13, %v164_v12  ;;  %v169_v17 = vor.u32 %v194_v14, %v166_v15  ;;  %v156_v18 = vld [vmem:[%s315_s2 + $0x20] sm:$0xf]  ;;  %v193_v19 = vld [vmem:[%s315_s2 + $0x24] sm:$0xf0]  ;;  %v192_v20 = vld [vmem:[%s315_s2 + $0x24] sm:$0xf] }
   0x6   :  { %v158_v21 = vld [vmem:[%s315_s2 + $0x28] sm:$0xf0]  ;;  %v157_v22 = vor.u32 %v193_v19, %v156_v18  ;;  %v148_v24 = vld [vmem:[%s315_s2 + $0x10] sm:$0xf]  ;;  %v191_v25 = vld [vmem:[%s315_s2 + $0x14] sm:$0xf0] }
   0x7   :  { %v161_v23 = vor.u32 %v192_v20, %v158_v21  ;;  %v190_v26 = vld [vmem:[%s315_s2 + $0x14] sm:$0xf]  ;;  %v150_v27 = vld [vmem:[%s315_s2 + $0x18] sm:$0xf0]  ;;  %v149_v28 = vor.u32 %v191_v25, %v148_v24  ;;  %v140_v30 = vld [vmem:[%s315_s2] sm:$0xf] }
   0x8   :  { %101 = vmatpush.bf16.msra.mxu0 %v173_v10  ;;  %v153_v29 = vor.u32 %v190_v26, %v150_v27  ;;  %v189_v31 = vld [vmem:[%s315_s2 + $0x4] sm:$0xf0]  ;;  %v188_v32 = vld [vmem:[%s315_s2 + $0x4] sm:$0xf]  ;;  %v142_v33 = vld [vmem:[%s315_s2 + $0x8] sm:$0xf0] }
   0x9   :  { %114 = vmatpush.bf16.msra.mxu1 %v177_v11  ;;  %v141_v34 = vor.u32 %v189_v31, %v140_v30  ;;  %v18_v35 = vld [vmem:[%s316_s0] sm:$0xff]  ;;  %v145_v36 = vor.u32 %v188_v32, %v142_v33  ;;  %v33_v41 = vld [vmem:[%s318_s1 + $0x8] sm:$0xff] }
   0xa   :  { %v19_v37 = vpack.c.bf16 %v18_v35, %v18_v35  ;;  %v124_v38 = vld [vmem:[%s317_s3] sm:$0x3] }
   0xb   :  { %v32_v39 = vld [vmem:[%s318_s1] sm:$0xff]  ;;  %v126_v40 = vperm.slane %v124_v38, 0  ;;  %v127_v43 = vperm.slane %v124_v38, 1 }
   0xc   :  { %102 = vmatpush.bf16.msra.mxu0 %v165_v16 }
   0xd   :  { %115 = vmatpush.bf16.msra.mxu1 %v169_v17 }
  0x10   :  { %103 = vmatpush.bf16.msra.mxu0 %v157_v22 }
  0x11   :  { %116 = vmatpush.bf16.msra.mxu1 %v161_v23 }
  0x14   :  { %104 = vmatpush.bf16.msra.mxu0 %v149_v28 }
  0x15   :  { %117 = vmatpush.bf16.msra.mxu1 %v153_v29 }
  0x18   :  { %105 = vmatpush.bf16.msra.mxu0 %v141_v34 }
  0x19   :  { %118 = vmatpush.bf16.msra.mxu1 %v145_v36 }
  0x1b   :  { %186 = vmatmul.msk.bf16.vlgmr.msra.gmra.mxu0 %vm94_vm0, %v19_v37 }
  0x1c   :  { %187 = vmatmul.msk.bf16.vlgmr.msra.gmra.mxu1 %vm94_vm0, %v19_v37 }
  0x98   :  { %v107_v42 = vpop.f32.mrf.mxu0 }
  0x99   :  { %v108_v44 = vadd.f32 %v107_v42, %v32_v39  ;;  %v120_v45 = vpop.f32.mrf.mxu1 }
  0x9a   :  { %v121_v46 = vadd.f32 %v120_v45, %v33_v41 }
  0x9b   :  { %v130_v47 = vadd.f32 %v126_v40, %v108_v44 }
  0x9c   :  { %v131_v48 = vadd.f32 %v127_v43, %v121_v46 }
  0x9d   :  { %132 = vst [vmem:[%s319_s4] sm:$0xff] %v130_v47 }
  0x9e   :  { %133 = vst [vmem:[%s319_s4 + $0x8] sm:$0xff] %v131_v48 }
  0xa0   :  { %v109_v49 = vpop.f32.mrf.mxu0 }
  0xa1   :  { %v122_v50 = vpop.f32.mrf.mxu1 }

</bundles_post_ra>
